<compile_context>
chip_gen: v7x
topology: tpu7x:2x2x1
jax: 0.10.0
libtpu: 0.0.40
codegen_flags: <defaults>
</compile_context>

<pallas_src>
import math

import jax
import jax.numpy as jnp
from jax import lax
from jax.experimental import pallas as pl
from jax.experimental.pallas import tpu as pltpu

NUM_CLASSES = 62
GROWTH = 32
BN_SIZE = 4
BLOCK_CONFIG = (6, 12, 24, 16)   # densenet121
NUM_INIT_FEATURES = 64
BN_EPS = 1e-5
CONV0_K = 7 * 7 * 3              # 147, used un-padded (full-extent K block)
CONV0_COUT = 128                 # 64 real channels zero-padded to a lane-dense 128


def _round_up(x, m):
    return ((x + m - 1) // m) * m


# ----------------------------------------------------------------------------
# Chip-aware VMEM limit (v7x has 64 MiB physical VMEM vs 128 MiB on v5e/v6e).
# ----------------------------------------------------------------------------
_VMEM_LIMIT = None


def _vmem_limit_bytes():
    global _VMEM_LIMIT
    if _VMEM_LIMIT is None:
        cap = 64 * 1024 * 1024                         # safe default for any chip
        try:
            info = pltpu.get_tpu_info()
            cap = int(getattr(info, "vmem_capacity_bytes", cap) or cap)
        except Exception:
            pass
        _VMEM_LIMIT = int(min(cap * 3 // 4, 96 * 1024 * 1024))
    return _VMEM_LIMIT


def _largest_divisor(m, cap, align=8):
    """Largest divisor of m that is a multiple of `align` and <= cap (None if none)."""
    best = None
    i = 1
    while i * i <= m:
        if m % i == 0:
            for d in (i, m // i):
                if d <= cap and d % align == 0 and (best is None or d > best):
                    best = d
        i += 1
    return best


# ----------------------------------------------------------------------------
# Pallas kernel 1: fused (BN+ReLU prologue) -> matmul -> (BN+ReLU epilogue)
# ----------------------------------------------------------------------------
def _make_mm_kernel(has_prologue, has_epilogue):
    def kernel(*refs):
        i = 0
        a_ref = refs[i]; i += 1
        if has_prologue:
            ps_ref, pt_ref = refs[i], refs[i + 1]; i += 2
        b_ref = refs[i]; i += 1
        if has_epilogue:
            es_ref, et_ref = refs[i], refs[i + 1]; i += 2
        o_ref, acc_ref = refs[i], refs[i + 1]

        @pl.when(pl.program_id(2) == 0)
        def _():
            acc_ref[...] = jnp.zeros_like(acc_ref)

        a = a_ref[...]
        if has_prologue:
            a = jnp.maximum(a.astype(jnp.float32) * ps_ref[...] + pt_ref[...], 0.0)
            a = a.astype(jnp.bfloat16)
        acc_ref[...] += jnp.dot(a, b_ref[...], preferred_element_type=jnp.float32)

        @pl.when(pl.program_id(2) == pl.num_programs(2) - 1)
        def _():
            r = acc_ref[...]
            if has_epilogue:
                r = jnp.maximum(r * es_ref[...] + et_ref[...], 0.0)
            o_ref[...] = r.astype(o_ref.dtype)

    return kernel


_TM_CAP = 2048
_MM_TILE_BYTES_BUDGET = 20 * 1024 * 1024   # working-set budget; safe on v5e/v6e/v7x


def _pick_tiles(M, K, Nn):
    """Divisor-aware tile selection (FMoW M always carries 7^2 factors)."""
    tn = 256 if Nn % 256 == 0 else (128 if Nn % 128 == 0 else Nn)
    tk = K
    for t in (512, 256, 128):
        if K % t == 0:
            tk = t
            break
    # bytes per tm row: A dbl-buf bf16 (4*tk) + f32 acc (4*tn) + out dbl-buf bf16 (4*tn)
    per_row = 4 * tk + 8 * tn
    fixed = 2 * tk * tn * 2                               # B double-buffered bf16
    cap = max(8, min(_TM_CAP, (_MM_TILE_BYTES_BUDGET - fixed) // per_row))
    tm = _largest_divisor(M, cap)
    if tm is None:
        tm = M          # no 8-aligned divisor (only tiny M in this network) -> full extent
    return tm, tk, tn


def fused_matmul(a, b, prologue=None, epilogue=None):
    """a: [M, Ka] bf16 (only the first K=b.shape[0] columns are read),
       b: [K, N]  bf16,
       prologue/epilogue: optional (scale, shift) f32 of shape (1, K) / (1, N)
       -> relu_e((relu_p(a*ps+pt) @ b)*es+et) as bf16, accumulated in f32."""
    M = a.shape[0]
    K, Nn = b.shape
    assert K <= a.shape[1]

    tm, tk, tn = _pick_tiles(M, K, Nn)
    grid = (M // tm, Nn // tn, K // tk)

    in_specs = [pl.BlockSpec((tm, tk), lambda i, j, k: (i, k))]
    args = [a]
    if prologue is not None:
        ps, pt = prologue
        in_specs += [pl.BlockSpec((1, tk), lambda i, j, k: (0, k)),
                     pl.BlockSpec((1, tk), lambda i, j, k: (0, k))]
        args += [ps, pt]
    in_specs.append(pl.BlockSpec((tk, tn), lambda i, j, k: (k, j)))
    args.append(b)
    if epilogue is not None:
        es, et = epilogue
        in_specs += [pl.BlockSpec((1, tn), lambda i, j, k: (0, j)),
                     pl.BlockSpec((1, tn), lambda i, j, k: (0, j))]
        args += [es, et]

    kernel = _make_mm_kernel(prologue is not None, epilogue is not None)
    return pl.pallas_call(
        kernel,
        out_shape=jax.ShapeDtypeStruct((M, Nn), jnp.bfloat16),
        grid_spec=pltpu.PrefetchScalarGridSpec(
            num_scalar_prefetch=0,
            grid=grid,
            in_specs=in_specs,
            out_specs=pl.BlockSpec((tm, tn), lambda i, j, k: (i, j)),
            scratch_shapes=[pltpu.VMEM((tm, tn), jnp.float32)],
        ),
        compiler_params=pltpu.CompilerParams(
            dimension_semantics=("parallel", "parallel", "arbitrary"),
            vmem_limit_bytes=_vmem_limit_bytes()),
    )(*args)


# ----------------------------------------------------------------------------
# Roll-convention probe: we need pull(x, dx)[i] == x[(i + dx) % n] along axis 0.
# Resolve pltpu.roll's direction once on-device; fall back to jnp.roll in-kernel.
# ----------------------------------------------------------------------------
_ROLL_MODE = None   # "fwd" -> pltpu.roll(x, n-dx, 0); "rev" -> pltpu.roll(x, dx, 0); "jnp"


def _resolve_roll_mode():
    global _ROLL_MODE
    if _ROLL_MODE is not None:
        return _ROLL_MODE
    mode = "jnp"
    try:
        n = 256
        x = jnp.broadcast_to(jnp.arange(n, dtype=jnp.float32)[:, None], (n, 32))

        def k(x_ref, o_ref):
            o_ref[...] = pltpu.roll(x_ref[...], n - 1, 0)

        y = pl.pallas_call(k, out_shape=jax.ShapeDtypeStruct((n, 32), jnp.float32))(x)
        if bool(jnp.all(y == jnp.roll(x, n - 1, axis=0))):
            mode = "fwd"
        elif bool(jnp.all(y == jnp.roll(x, -(n - 1), axis=0))):
            mode = "rev"
    except Exception:
        mode = "jnp"
    _ROLL_MODE = mode
    return mode


def _make_pull():
    mode = _resolve_roll_mode()

    def pull(x, dx):
        """pull(x, dx)[i] == x[(i + dx) % n] along axis 0 (XLU rotate when possible)."""
        if dx == 0:
            return x
        n = x.shape[0]
        if mode == "fwd":
            return pltpu.roll(x, n - dx, 0)
        if mode == "rev":
            return pltpu.roll(x, dx, 0)
        return jnp.roll(x, -dx, axis=0)

    return pull


# ----------------------------------------------------------------------------
# Pallas kernel 2: 3x3 conv (pad=1, stride=1, Cin=128, Cout=32).
#   - row taps: free leading-dim slices of the [nb, Hp, Wp, C] block
#   - column taps: stacked on the matmul N dim (N=96), combined with XLU rolls
# ----------------------------------------------------------------------------
def conv3x3_32(x_act, w_st):
    """x_act: [N, H, W, 128] bf16 (already BN+ReLU'd);
       w_st : [3, 128, 96] bf16 with w_st[dy, :, dx*32:(dx+1)*32] = W[dy, dx].
       Returns [N, H, W, 32] bf16."""
    N, H, W, C = x_act.shape
    Cout = GROWTH
    Hp = H + 2
    Wp = _round_up(W + 2, 8)                    # sublane-dense padded width (>= W+2)
    xp = jnp.pad(x_act, ((0, 0), (1, 1), (1, Wp - W - 1), (0, 0)))

    # batch several images per grid step when the (double-buffered) block fits VMEM
    per_img = Hp * Wp * C * 2
    nb_cap = max(1, min(8, (4 * 1024 * 1024) // per_img))
    nb = 1
    for d in range(1, min(N, nb_cap) + 1):
        if N % d == 0:
            nb = d

    M = nb * H * Wp
    pull = _make_pull()

    def kernel(x_ref, w_ref, o_ref):
        xv = x_ref[...]                                     # [nb, Hp, Wp, C]
        acc = None
        for dy in range(3):                                 # row taps: free leading-dim slices
            a = xv[:, dy:dy + H].reshape(M, C)
            d = jnp.dot(a, w_ref[dy], preferred_element_type=jnp.float32)
            acc = d if acc is None else acc + d             # [M, 96] f32
        # column taps were stacked on the matmul N dim; combine with rolls (XLU)
        y = acc[:, 0:Cout]
        y = y + pull(acc[:, Cout:2 * Cout], 1)
        y = y + pull(acc[:, 2 * Cout:3 * Cout], 2)
        o_ref[...] = y.reshape(nb, H, Wp, Cout).astype(o_ref.dtype)

    out = pl.pallas_call(
        kernel,
        out_shape=jax.ShapeDtypeStruct((N, H, Wp, Cout), jnp.bfloat16),
        grid_spec=pltpu.PrefetchScalarGridSpec(
            num_scalar_prefetch=0,
            grid=(N // nb,),
            in_specs=[pl.BlockSpec((nb, Hp, Wp, C), lambda n: (n, 0, 0, 0)),
                      pl.BlockSpec((3, C, 3 * Cout), lambda n: (0, 0, 0))],
            out_specs=pl.BlockSpec((nb, H, Wp, Cout), lambda n: (n, 0, 0, 0)),
        ),
        compiler_params=pltpu.CompilerParams(
            dimension_semantics=("parallel",),
            vmem_limit_bytes=_vmem_limit_bytes()),
    )(xp, w_st)
    return out[:, :, :W, :]


# ----------------------------------------------------------------------------
# Pallas kernel 3: fused head (norm5 -> ReLU -> global avg pool -> Linear(1024, 62))
# ----------------------------------------------------------------------------
def head_pallas(x, scale, shift, w, b):
    """x: [N, H, W, 1024] bf16; scale/shift: (1, 1024) f32;
       w: [1024, 128] bf16 (62 real cols zero-padded); b: (1, 128) f32."""
    N, H, W, C = x.shape
    HW = H * W
    NCp = w.shape[1]
    xf = x.reshape(N, HW, C)
    inv = 1.0 / HW
    bn = _largest_divisor(N, min(N, 32)) or N        # batch rows per grid step

    def kernel(x_ref, s_ref, t_ref, w_ref, b_ref, o_ref):
        xv = x_ref[...].astype(jnp.float32)                     # [bn, HW, C]
        xv = jnp.maximum(xv * s_ref[...] + t_ref[...], 0.0)     # norm5 + relu
        pooled = jnp.sum(xv, axis=1) * inv                      # [bn, C] global avg pool
        out = jnp.dot(pooled.astype(jnp.bfloat16), w_ref[...],
                      preferred_element_type=jnp.float32) + b_ref[...]
        o_ref[...] = out

    out = pl.pallas_call(
        kernel,
        out_shape=jax.ShapeDtypeStruct((N, NCp), jnp.float32),
        grid_spec=pltpu.PrefetchScalarGridSpec(
            num_scalar_prefetch=0,
            grid=(N // bn,),
            in_specs=[pl.BlockSpec((bn, HW, C), lambda i: (i, 0, 0)),
                      pl.BlockSpec((1, C), lambda i: (0, 0)),
                      pl.BlockSpec((1, C), lambda i: (0, 0)),
                      pl.BlockSpec((C, NCp), lambda i: (0, 0)),
                      pl.BlockSpec((1, NCp), lambda i: (0, 0))],
            out_specs=pl.BlockSpec((bn, NCp), lambda i: (i, 0)),
        ),
        compiler_params=pltpu.CompilerParams(
            dimension_semantics=("parallel",),
            vmem_limit_bytes=_vmem_limit_bytes()),
    )(xf, scale, shift, w, b)
    return out[:, :NUM_CLASSES]


# ----------------------------------------------------------------------------
# Plain-JAX glue (layout plumbing around the kernels)
# ----------------------------------------------------------------------------
def im2col(x, k, stride, pad):
    """Patch matrix [N*Ho*Wo, k*k*C] (row order ki, kj, cin).  Used only for conv0."""
    # TODO(synk): fuse the stride-2 7x7 im2col into the conv0 kernel to avoid the
    # materialized patch matrix (conv0 is HBM-bound).
    N, H, W, C = x.shape
    Ho = (H + 2 * pad - k) // stride + 1
    Wo = (W + 2 * pad - k) // stride + 1
    xp = jnp.pad(x, ((0, 0), (pad, pad), (pad, pad), (0, 0)))
    cols = []
    for i in range(k):
        for j in range(k):
            cols.append(xp[:, i:i + stride * (Ho - 1) + 1:stride,
                           j:j + stride * (Wo - 1) + 1:stride, :])
    patches = jnp.concatenate(cols, axis=-1).reshape(N * Ho * Wo, k * k * C)
    return patches, Ho, Wo


# TODO(synk): max/avg pooling windows stay as plain-JAX glue (tiny fraction of compute).
def maxpool_3x3_s2_p1(x):
    N, H, W, C = x.shape
    xp = jnp.pad(x, ((0, 0), (1, 1), (1, 1), (0, 0)), constant_values=-jnp.inf)
    Ho = (H + 2 - 3) // 2 + 1
    Wo = (W + 2 - 3) // 2 + 1
    out = None
    for i in range(3):
        for j in range(3):
            s = xp[:, i:i + 2 * (Ho - 1) + 1:2, j:j + 2 * (Wo - 1) + 1:2, :]
            out = s if out is None else jnp.maximum(out, s)
    return out


def avgpool_2x2(x):
    N, H, W, C = x.shape
    return x.reshape(N, H // 2, 2, W // 2, 2, C).mean(axis=(2, 4))


# ----------------------------------------------------------------------------
# Deterministic parameter initialization (densenet121.features + classifier)
# Weights are bf16 (MXU inputs), folded BN scale/shift are f32, padded once here.
# ----------------------------------------------------------------------------
def _he_w(key, fan_in, shape):
    std = math.sqrt(2.0 / fan_in)
    return (std * jax.random.normal(key, shape, jnp.float32)).astype(jnp.bfloat16)


def _fold_bn(key, c):
    k1, k2, k3, k4 = jax.random.split(key, 4)
    gamma = 1.0 + 0.1 * jax.random.normal(k1, (c,), jnp.float32)
    beta = 0.1 * jax.random.normal(k2, (c,), jnp.float32)
    mean = 0.1 * jax.random.normal(k3, (c,), jnp.float32)
    var = 1.0 + 0.1 * jnp.abs(jax.random.normal(k4, (c,), jnp.float32))
    scale = gamma / jnp.sqrt(var + BN_EPS)
    shift = beta - mean * scale
    return scale.reshape(1, c), shift.reshape(1, c)


def init_params(key):
    keys = iter(jax.random.split(key, 2048))
    nk = lambda: next(keys)
    p = {}
    # conv0: 7x7x3 -> 64 real channels, zero-padded to 128 output cols (lane-dense)
    w0 = _he_w(nk(), CONV0_K, (CONV0_K, NUM_INIT_FEATURES))
    p["conv0_w"] = jnp.pad(w0, ((0, 0), (0, CONV0_COUT - NUM_INIT_FEATURES)))
    s0, t0 = _fold_bn(nk(), NUM_INIT_FEATURES)
    p["norm0"] = (jnp.pad(s0, ((0, 0), (0, CONV0_COUT - NUM_INIT_FEATURES))),
                  jnp.pad(t0, ((0, 0), (0, CONV0_COUT - NUM_INIT_FEATURES))))

    c = NUM_INIT_FEATURES
    blocks = []
    for bi, n_layers in enumerate(BLOCK_CONFIG):
        layers = []
        for _ in range(n_layers):
            kcov = _round_up(c, 128)
            s1, t1 = _fold_bn(nk(), c)
            s1 = jnp.pad(s1, ((0, 0), (0, kcov - c)))
            t1 = jnp.pad(t1, ((0, 0), (0, kcov - c)))
            w1 = jnp.pad(_he_w(nk(), c, (c, BN_SIZE * GROWTH)),
                         ((0, kcov - c), (0, 0)))
            s2, t2 = _fold_bn(nk(), BN_SIZE * GROWTH)
            w2 = _he_w(nk(), 9 * BN_SIZE * GROWTH, (3, 3, BN_SIZE * GROWTH, GROWTH))
            # stack the 3 column taps on the matmul N dim -> [3, 128, 96]
            w2 = jnp.transpose(w2, (0, 2, 1, 3)).reshape(3, BN_SIZE * GROWTH, 3 * GROWTH)
            layers.append(dict(s1=s1, t1=t1, w1=w1, s2=s2, t2=t2, w2=w2))
            c += GROWTH
        block = dict(layers=layers)
        if bi != len(BLOCK_CONFIG) - 1:
            ts, tt = _fold_bn(nk(), c)
            block["trans_s"], block["trans_t"] = ts, tt
            block["trans_w"] = _he_w(nk(), c, (c, c // 2))
            c //= 2
        blocks.append(block)
    p["blocks"] = blocks

    p["norm5"] = _fold_bn(nk(), c)                       # c == 1024
    kw, kb = jax.random.split(nk())
    bound = 1.0 / math.sqrt(1024)
    wc = jax.random.uniform(kw, (1024, NUM_CLASSES), jnp.float32, -bound, bound)
    bc = jax.random.uniform(kb, (1, NUM_CLASSES), jnp.float32, -bound, bound)
    # classifier output padded 62 -> 128 columns for a lane-dense head store
    p["cls_w"] = jnp.pad(wc, ((0, 0), (0, 128 - NUM_CLASSES))).astype(jnp.bfloat16)
    p["cls_b"] = jnp.pad(bc, ((0, 0), (0, 128 - NUM_CLASSES)))
    return p


# ----------------------------------------------------------------------------
# FMoWNetwork.forward
# ----------------------------------------------------------------------------
def fmow_forward(params, x_nchw):
    # PyTorch feeds NCHW; transpose to NHWC once and drop to bf16 for the MXU.
    x = jnp.transpose(x_nchw, (0, 2, 3, 1)).astype(jnp.bfloat16)
    N = x.shape[0]

    # conv0 (7x7 s2 p3) + fused norm0 + relu0 epilogue (output channels 64 -> 128 pad)
    patches, Ho, Wo = im2col(x, 7, 2, 3)
    s0, t0 = params["norm0"]
    x = fused_matmul(patches, params["conv0_w"], epilogue=(s0, t0))
    x = x.reshape(N, Ho, Wo, CONV0_COUT)
    x = maxpool_3x3_s2_p1(x)                              # pool0; pad channels stay 0

    c = NUM_INIT_FEATURES                                  # logical channel count
    for block in params["blocks"]:
        n_layers = len(block["layers"])
        c_total = c + GROWTH * n_layers
        Nb, H, W, c_phys = x.shape
        # pre-allocated channel slab replaces DenseNet concatenation; channels >= c are
        # ignored (padded 1x1 weights / BN scales are zero there) until overwritten.
        slab = jnp.pad(x, ((0, 0), (0, 0), (0, 0), (0, c_total - c_phys)))
        for layer in block["layers"]:
            slab2d = slab.reshape(Nb * H * W, c_total)
            # 1x1 bottleneck conv with fused norm1+relu prologue and norm2+relu epilogue
            x1 = fused_matmul(slab2d, layer["w1"],
                              prologue=(layer["s1"], layer["t1"]),
                              epilogue=(layer["s2"], layer["t2"]))
            x1 = x1.reshape(Nb, H, W, BN_SIZE * GROWTH)
            h = conv3x3_32(x1, layer["w2"])               # 3x3 conv, 32 new channels
            # TODO(synk): stage 4 layers in a 128-wide side buffer for lane-aligned
            # slab updates instead of 32-channel-offset dynamic_update_slice.
            slab = lax.dynamic_update_slice(slab, h, (0, 0, 0, c))
            c += GROWTH
        if "trans_w" in block:                            # transition layer
            slab2d = slab.reshape(Nb * H * W, c_total)
            y = fused_matmul(slab2d, block["trans_w"],
                             prologue=(block["trans_s"], block["trans_t"]))
            x = avgpool_2x2(y.reshape(Nb, H, W, c_total // 2))
            c = c_total // 2
        else:
            x = slab

    # norm5 + F.relu + adaptive_avg_pool2d((1,1)) + flatten + classifier
    s5, t5 = params["norm5"]
    return head_pallas(x, s5, t5, params["cls_w"], params["cls_b"])


# ----------------------------------------------------------------------------
if __name__ == "__main__":
    key = jax.random.PRNGKey(0)
    pkey, xkey = jax.random.split(key)

    # --- unit checks of the Pallas kernels against plain-JAX references (bf16 tolerances)
    k1, k2, k3, k4, k5 = jax.random.split(jax.random.PRNGKey(1), 5)
    A = jax.random.normal(k1, (64, 256), jnp.float32).astype(jnp.bfloat16)
    B = (0.1 * jax.random.normal(k2, (256, 128), jnp.float32)).astype(jnp.bfloat16)
    ps = 1.0 + 0.1 * jax.random.normal(k3, (1, 256), jnp.float32)
    pt = 0.1 * jax.random.normal(k3, (1, 256), jnp.float32)
    es = 1.0 + 0.1 * jax.random.normal(k4, (1, 128), jnp.float32)
    et = 0.1 * jax.random.normal(k4, (1, 128), jnp.float32)
    out = fused_matmul(A, B, prologue=(ps, pt), epilogue=(es, et)).astype(jnp.float32)
    a32 = jnp.maximum(A.astype(jnp.float32) * ps + pt, 0.0).astype(jnp.bfloat16).astype(jnp.float32)
    ref = jnp.maximum(a32 @ B.astype(jnp.float32) * es + et, 0.0)
    assert jnp.allclose(out, ref, atol=5e-2, rtol=5e-2), "fused_matmul mismatch"

    # non-square, non-multiple-of-8 resolution to exercise padding / roll boundaries
    xc = jnp.maximum(jax.random.normal(k5, (2, 6, 10, 128), jnp.float32), 0.0).astype(jnp.bfloat16)
    wc4 = (0.05 * jax.random.normal(k2, (3, 3, 128, 32), jnp.float32)).astype(jnp.bfloat16)
    wst = jnp.transpose(wc4, (0, 2, 1, 3)).reshape(3, 128, 96)
    outc = conv3x3_32(xc, wst).astype(jnp.float32)
    refc = lax.conv_general_dilated(
        xc.astype(jnp.float32), wc4.astype(jnp.float32),
        window_strides=(1, 1), padding=((1, 1), (1, 1)),
        dimension_numbers=("NHWC", "HWIO", "NHWC"))
    assert jnp.allclose(outc, refc, atol=5e-2, rtol=5e-2), "conv3x3 mismatch"

    xc2 = jnp.maximum(jax.random.normal(k4, (1, 8, 8, 128), jnp.float32), 0.0).astype(jnp.bfloat16)
    outc2 = conv3x3_32(xc2, wst).astype(jnp.float32)
    refc2 = lax.conv_general_dilated(
        xc2.astype(jnp.float32), wc4.astype(jnp.float32),
        window_strides=(1, 1), padding=((1, 1), (1, 1)),
        dimension_numbers=("NHWC", "HWIO", "NHWC"))
    assert jnp.allclose(outc2, refc2, atol=5e-2, rtol=5e-2), "conv3x3 mismatch (8x8)"

    # --- full network (NCHW input, small but valid for densenet121's /32 downsampling)
    params = init_params(pkey)
    x = jax.random.normal(xkey, (2, 3, 32, 32), jnp.float32)
    forward = jax.jit(fmow_forward)
    logits = jax.block_until_ready(forward(params, x))
    assert logits.shape == (2, NUM_CLASSES)
    assert bool(jnp.all(jnp.isfinite(logits)))
    print("KERNEL_OK")
</pallas_src>

<mosaic_0001>
module attributes {stable_mosaic.version = 11 : i64} {
  func.func @kernel(%arg0: i32, %arg1: i32, %arg2: i32, %arg3: memref<64x256xbf16, #tpu.memory_space<vmem>>, %arg4: memref<1x256xf32, #tpu.memory_space<vmem>>, %arg5: memref<1x256xf32, #tpu.memory_space<vmem>>, %arg6: memref<256x128xbf16, #tpu.memory_space<vmem>>, %arg7: memref<1x128xf32, #tpu.memory_space<vmem>>, %arg8: memref<1x128xf32, #tpu.memory_space<vmem>>, %arg9: memref<64x128xbf16, #tpu.memory_space<vmem>>, %arg10: memref<64x128xf32, #tpu.memory_space<vmem>>) attributes {dimension_semantics = [#tpu.dimension_semantics<parallel>, #tpu.dimension_semantics<parallel>, #tpu.dimension_semantics<arbitrary>], iteration_bounds = array<i64: 1, 1, 1>, scalar_prefetch = 0 : i64, scratch_operands = 1 : i64, tpu.core_type = #tpu.core_type<tc>, window_params = [{transform_indices = @transform_0, window_bounds = array<i64: 64, 256>}, {transform_indices = @transform_1, window_bounds = array<i64: 1, 256>}, {transform_indices = @transform_2, window_bounds = array<i64: 1, 256>}, {transform_indices = @transform_3, window_bounds = array<i64: 256, 128>}, {transform_indices = @transform_4, window_bounds = array<i64: 1, 128>}, {transform_indices = @transform_5, window_bounds = array<i64: 1, 128>}, {transform_indices = @transform_6, window_bounds = array<i64: 64, 128>}]} {
    %c0_i32 = arith.constant 0 : i32
    %0 = arith.cmpi eq, %arg2, %c0_i32 : i32
    %1 = arith.extui %0 : i1 to i32
    %c0_i32_0 = arith.constant 0 : i32
    %2 = arith.cmpi ne, %1, %c0_i32_0 : i32
    scf.if %2 {
      %cst_15 = arith.constant 0.000000e+00 : f32
      %22 = vector.broadcast %cst_15 : f32 to vector<64x128xf32>
      %c0_16 = arith.constant 0 : index
      %c0_17 = arith.constant 0 : index
      %23 = vector.load %arg10[%c0_16, %c0_17] : memref<64x128xf32, #tpu.memory_space<vmem>>, vector<64x128xf32>
      tpu.vector_store %arg10[%c0_16, %c0_17], %22 {strides = array<i32>} : memref<64x128xf32, #tpu.memory_space<vmem>>, vector<64x128xf32>,
    } else {
    }
    %c0 = arith.constant 0 : index
    %c0_1 = arith.constant 0 : index
    %3 = vector.load %arg3[%c0, %c0_1] : memref<64x256xbf16, #tpu.memory_space<vmem>>, vector<64x256xbf16>
    %4 = arith.extf %3 : vector<64x256xbf16> to vector<64x256xf32>
    %c0_2 = arith.constant 0 : index
    %c0_3 = arith.constant 0 : index
    %5 = vector.load %arg4[%c0_2, %c0_3] : memref<1x256xf32, #tpu.memory_space<vmem>>, vector<1x256xf32>
    %6 = vector.broadcast %5 : vector<1x256xf32> to vector<64x256xf32>
    %7 = arith.mulf %4, %6 : vector<64x256xf32>
    %c0_4 = arith.constant 0 : index
    %c0_5 = arith.constant 0 : index
    %8 = vector.load %arg5[%c0_4, %c0_5] : memref<1x256xf32, #tpu.memory_space<vmem>>, vector<1x256xf32>
    %9 = vector.broadcast %8 : vector<1x256xf32> to vector<64x256xf32>
    %10 = arith.addf %7, %9 : vector<64x256xf32>
    %cst = arith.constant 0.000000e+00 : f32
    %11 = vector.broadcast %cst : f32 to vector<64x256xf32>
    %12 = arith.maximumf %10, %11 : vector<64x256xf32>
    %13 = arith.truncf %12 : vector<64x256xf32> to vector<64x256xbf16>
    %c0_6 = arith.constant 0 : index
    %c0_7 = arith.constant 0 : index
    %14 = vector.load %arg10[%c0_6, %c0_7] : memref<64x128xf32, #tpu.memory_space<vmem>>, vector<64x128xf32>
    %c0_8 = arith.constant 0 : index
    %c0_9 = arith.constant 0 : index
    %15 = vector.load %arg6[%c0_8, %c0_9] : memref<256x128xbf16, #tpu.memory_space<vmem>>, vector<256x128xbf16>
    %cst_10 = arith.constant dense<0.000000e+00> : vector<64x128xf32>
    %16 = tpu.matmul %13, %15, %cst_10 {dimension_numbers = #tpu.dot_dimension_numbers<[1], [0], [0], [1], [0, 0, 1, 1], [], []>} : vector<64x256xbf16>, vector<256x128xbf16>, vector<64x128xf32> -> vector<64x128xf32>
    %17 = arith.addf %14, %16 : vector<64x128xf32>
    %c0_11 = arith.constant 0 : index
    %c0_12 = arith.constant 0 : index
    %18 = vector.load %arg10[%c0_11, %c0_12] : memref<64x128xf32, #tpu.memory_space<vmem>>, vector<64x128xf32>
    tpu.vector_store %arg10[%c0_11, %c0_12], %17 {strides = array<i32>} : memref<64x128xf32, #tpu.memory_space<vmem>>, vector<64x128xf32>,
    %c0_i32_13 = arith.constant 0 : i32
    %19 = arith.cmpi eq, %arg2, %c0_i32_13 : i32
    %20 = arith.extui %19 : i1 to i32
    %c0_i32_14 = arith.constant 0 : i32
    %21 = arith.cmpi ne, %20, %c0_i32_14 : i32
    scf.if %21 {
      %c0_15 = arith.constant 0 : index
      %c0_16 = arith.constant 0 : index
      %22 = vector.load %arg10[%c0_15, %c0_16] : memref<64x128xf32, #tpu.memory_space<vmem>>, vector<64x128xf32>
      %c0_17 = arith.constant 0 : index
      %c0_18 = arith.constant 0 : index
      %23 = vector.load %arg7[%c0_17, %c0_18] : memref<1x128xf32, #tpu.memory_space<vmem>>, vector<1x128xf32>
      %24 = vector.broadcast %23 : vector<1x128xf32> to vector<64x128xf32>
      %25 = arith.mulf %22, %24 : vector<64x128xf32>
      %c0_19 = arith.constant 0 : index
      %c0_20 = arith.constant 0 : index
      %26 = vector.load %arg8[%c0_19, %c0_20] : memref<1x128xf32, #tpu.memory_space<vmem>>, vector<1x128xf32>
      %27 = vector.broadcast %26 : vector<1x128xf32> to vector<64x128xf32>
      %28 = arith.addf %25, %27 : vector<64x128xf32>
      %cst_21 = arith.constant 0.000000e+00 : f32
      %29 = vector.broadcast %cst_21 : f32 to vector<64x128xf32>
      %30 = arith.maximumf %28, %29 : vector<64x128xf32>
      %31 = arith.truncf %30 : vector<64x128xf32> to vector<64x128xbf16>
      %c0_22 = arith.constant 0 : index
      %c0_23 = arith.constant 0 : index
      %32 = vector.load %arg9[%c0_22, %c0_23] : memref<64x128xbf16, #tpu.memory_space<vmem>>, vector<64x128xbf16>
      tpu.vector_store %arg9[%c0_22, %c0_23], %31 {strides = array<i32>} : memref<64x128xbf16, #tpu.memory_space<vmem>>, vector<64x128xbf16>,
    } else {
    }
    return
  }
  func.func @transform_0(%arg0: i32, %arg1: i32, %arg2: i32) -> (i32, i32) {
    %c0_i32 = arith.constant 0 : i32
    return %arg0, %arg2 : i32, i32
  }
  func.func @transform_1(%arg0: i32, %arg1: i32, %arg2: i32) -> (i32, i32) {
    %c0_i32 = arith.constant 0 : i32
    %c0_i32_0 = arith.constant 0 : i32
    return %c0_i32, %arg2 : i32, i32
  }
  func.func @transform_2(%arg0: i32, %arg1: i32, %arg2: i32) -> (i32, i32) {
    %c0_i32 = arith.constant 0 : i32
    %c0_i32_0 = arith.constant 0 : i32
    return %c0_i32, %arg2 : i32, i32
  }
  func.func @transform_3(%arg0: i32, %arg1: i32, %arg2: i32) -> (i32, i32) {
    %c0_i32 = arith.constant 0 : i32
    return %arg2, %arg1 : i32, i32
  }
  func.func @transform_4(%arg0: i32, %arg1: i32, %arg2: i32) -> (i32, i32) {
    %c0_i32 = arith.constant 0 : i32
    %c0_i32_0 = arith.constant 0 : i32
    return %c0_i32, %arg1 : i32, i32
  }
  func.func @transform_5(%arg0: i32, %arg1: i32, %arg2: i32) -> (i32, i32) {
    %c0_i32 = arith.constant 0 : i32
    %c0_i32_0 = arith.constant 0 : i32
    return %c0_i32, %arg1 : i32, i32
  }
  func.func @transform_6(%arg0: i32, %arg1: i32, %arg2: i32) -> (i32, i32) {
    %c0_i32 = arith.constant 0 : i32
    return %arg0, %arg1 : i32, i32
  }
}

</mosaic_0001>

<bundles_post_ra>
// kernel: tpu_custom_call.1
= control target key start
LH: loop header
LB: loop body
LE: loop exit
PB: predicated region body
PF: predicated region fallthrough
CT: control target
= control target key end

     0   :  { %11 = vsyncpa [#allocation4], 0  ;;  %s841_s0 = inlined_call_operand.hbm [shape: bf16[64,256], index: 0, kind: input, shape index: {}]   ;;  %s842_s1 = inlined_call_operand.vmem [shape: f32[1,256], index: 1, kind: input, shape index: {}]   ;;  %s843_s2 = inlined_call_operand.vmem [shape: f32[1,256], index: 2, kind: input, shape index: {}]   ;;  %s844_s3 = inlined_call_operand.hbm [shape: bf16[256,128], index: 3, kind: input, shape index: {}]   ;;  %s845_s4 = inlined_call_operand.vmem [shape: f32[1,128], index: 4, kind: input, shape index: {}]   ;;  %s846_s5 = inlined_call_operand.vmem [shape: f32[1,128], index: 5, kind: input, shape index: {}]   ;;  %s847_s6 = inlined_call_operand.hbm [shape: bf16[64,128], index: 6, kind: output, shape index: {}]  }
   0x1   :  { %12 = vsyncpa [#allocation7], 0 }
   0x2   :  { %13 = vsyncpa [#allocation5], 0  ;;  %s701_s21 = smov [#allocation3]   ;;  %s629_s25 = scalar_lea.hbm %s841_s0, 1024 }
   0x3   :  { %s19_s22 = sshll.u32 %s701_s21, 4  ;;  %p630_p0 = scmp.ne.s32.totalorder %s841_s0, %s629_s25  ;;  %s20_s22 = int_to_ptr.vmem [resolvable:$true] %s19_s22 }
   0x4   :  { %p633_p1 = scmp.lt.u32.totalorder %s629_s25, %s841_s0 }
   0x6   :  { %p635_p2 = pnand %p633_p1, %p630_p0 }
   0x8   :  { %638 = shalt.err (!%p635_p2)
}
   0x9   :  { %s639_s30 = scalar_lea.vmem %s20_s22, 1024  ;;  %p644_p4 = scmp.lt.s32.totalorder %s20_s22, %s20_s22 }
   0xa   :  { %p640_p3 = scmp.ne.s32.totalorder %s20_s22, %s639_s30  ;;  %p645_p5 = scmp.lt.s32.totalorder %s639_s30, %s639_s30 }
   0xc   :  { %p646_p6 = por %p645_p5, %p644_p4 }
   0xe   :  { %p647_p7 = pnand %p646_p6, %p640_p3 }
  0x10   :  { %650 = shalt.err (!%p647_p7)
}
  0x11   :  { %s702_s7 = smov 128   ;;  %s703_s8 = smov 8  }
  0x12   :  { %25 = dma.hbm_to_vmem [thread:$0]  %s841_s0, 1024, %s20_s22, [#allocation4], %s702_s7, %s702_s7, %s703_s8  }
  0x13   :  { %s704_s11 = smov [#allocation6]   ;;  %s651_s15 = scalar_lea.hbm %s844_s3, 2048 }
  0x14   :  { %s35_s12 = sshll.u32 %s704_s11, 4  ;;  %p652_p8 = scmp.ne.s32.totalorder %s844_s3, %s651_s15  ;;  %s36_s12 = int_to_ptr.vmem [resolvable:$true] %s35_s12 }
  0x15   :  { %p655_p9 = scmp.lt.u32.totalorder %s651_s15, %s844_s3 }
  0x17   :  { %p657_p10 = pnand %p655_p9, %p652_p8 }
  0x19   :  { %660 = shalt.err (!%p657_p10)
}
  0x1a   :  { %s661_s20 = scalar_lea.vmem %s36_s12, 2048  ;;  %p666_p12 = scmp.lt.s32.totalorder %s36_s12, %s36_s12 }
  0x1b   :  { %p662_p11 = scmp.ne.s32.totalorder %s36_s12, %s661_s20  ;;  %p667_p13 = scmp.lt.s32.totalorder %s661_s20, %s661_s20 }
  0x1d   :  { %p668_p0 = por %p667_p13, %p666_p12 }
  0x1f   :  { %p669_p1 = pnand %p668_p0, %p662_p11 }
  0x21   :  { %672 = shalt.err (!%p669_p1)
}
  0x22   :  { %s705_s0 = smov 64   ;;  %s706_s21 = smov 4  }
  0x23   :  { %41 = dma.hbm_to_vmem [thread:$0]  %s844_s3, 2048, %s36_s12, [#allocation7], %s705_s0, %s705_s0, %s706_s21  }
  0x24   :  { %695 = dma.done.wait [#allocation4], 1024  }
  0x25   :  { %696 = vsyncadd [#allocation4], 4294966272 }
  0x26   :  { %697 = dma.done.wait [#allocation7], 2048  }
  0x27   :  { %698 = vsyncadd [#allocation7], 4294965248  ;;  %v613_v0 = vld [vmem:[#allocation6 + $0x40] sm:$0xff]   ;;  %v615_v2 = vld [vmem:[#allocation6 + $0x48] sm:$0xff]   ;;  %v91_v5 = vlaneseq }
  0x28   :  { %v614_v1 = vld [vmem:[#allocation6] sm:$0xff]   ;;  %550 = vmatprep.subr.bf16.mxu0 %v613_v0  ;;  %590 = vmatprep.subr.bf16.mxu1 %v613_v0  ;;  %v616_v3 = vld [vmem:[#allocation6 + $0x8] sm:$0xff]   ;;  %v617_v4 = vld [vmem:[#allocation6 + $0x50] sm:$0xff]  }
  0x29   :  { %551 = vmatpush3.bf16.msra.mxu0 %v614_v1  ;;  %598 = vmatpush3.bf16.msra.mxu1 %v614_v1  ;;  %v618_v6 = vld [vmem:[#allocation6 + $0x10] sm:$0xff]   ;;  %v619_v7 = vld [vmem:[#allocation6 + $0x58] sm:$0xff]   ;;  %v92_v8 = vshrl.u32 %v91_v5, 7  ;;  %v621_v10 = vld [vmem:[#allocation6 + $0x60] sm:$0xff]  }
  0x2a   :  { %552 = vmatprep.subr.bf16.mxu0 %v615_v2  ;;  %591 = vmatprep.subr.bf16.mxu1 %v615_v2  ;;  %v620_v9 = vld [vmem:[#allocation6 + $0x18] sm:$0xff]   ;;  %v622_v12 = vld [vmem:[#allocation6 + $0x20] sm:$0xff]   ;;  %v623_v14 = vld [vmem:[#allocation6 + $0x68] sm:$0xff]  }
  0x2b   :  { %v93_v11 = vsub.s32 0, %v92_v8  ;;  %v97_v13 = vsub.s32 1, %v92_v8  ;;  %v65_v15 = vld [vmem:[#allocation3] sm:$0xff]  ;;  %v66_v16 = vld [vmem:[#allocation3 + $0x8] sm:$0xff]  ;;  %v784_v29 = vld [vmem:[#allocation3 + $0x10] sm:$0xff] }
  0x2c   :  { %v89_v17 = vld [vmem:[%s842_s1] sm:$0x3]  ;;  %v73_v18 = vunpack.c.l.bf16 %v65_v15  ;;  %v74_v19 = vunpack.c.h.bf16 %v65_v15  ;;  %v75_v20 = vunpack.c.l.bf16 %v66_v16  ;;  %v76_v21 = vunpack.c.h.bf16 %v66_v16  ;;  %v70_v24 = vld [vmem:[#allocation3 + $0x28] sm:$0xff]  ;;  %v625_v35 = vld [vmem:[#allocation6 + $0x70] sm:$0xff]  }
  0x2d   :  { %553 = vmatpush3.bf16.msra.mxu0 %v616_v3  ;;  %599 = vmatpush3.bf16.msra.mxu1 %v616_v3  ;;  %v117_v22 = vld [vmem:[%s843_s2] sm:$0x3]  ;;  %v776_v25 = vrot.slane %v89_v17, %v93_v11  ;;  %v778_v26 = vrot.slane %v89_v17, %v97_v13  ;;  %v624_v30 = vld [vmem:[#allocation6 + $0x28] sm:$0xff]   ;;  %v83_v33 = vunpack.c.l.bf16 %v70_v24  ;;  %v84_v34 = vunpack.c.h.bf16 %v70_v24  ;;  %v68_v39 = vld [vmem:[#allocation3 + $0x18] sm:$0xff] }
  0x2e   :  { %554 = vmatprep.subr.bf16.mxu0 %v617_v4  ;;  %592 = vmatprep.subr.bf16.mxu1 %v617_v4  ;;  %v69_v23 = vld [vmem:[#allocation3 + $0x20] sm:$0xff]  ;;  %v780_v27 = vrot.slane %v117_v22, %v93_v11  ;;  %v782_v28 = vrot.slane %v117_v22, %v97_v13  ;;  %v78_v40 = vunpack.c.h.bf16 %v784_v29  ;;  %v626_v49 = vld [vmem:[#allocation6 + $0x30] sm:$0xff]   ;;  %v80_v53 = vunpack.c.h.bf16 %v68_v39  ;;  %v627_v54 = vld [vmem:[#allocation6 + $0x78] sm:$0xff]  }
  0x2f   :  { %v81_v31 = vunpack.c.l.bf16 %v69_v23  ;;  %v82_v32 = vunpack.c.h.bf16 %v69_v23  ;;  %v102_v36 = vmul.f32 %v778_v26, %v74_v19  ;;  %v104_v37 = vmul.f32 %v778_v26, %v76_v21  ;;  %v71_v59 = vld [vmem:[#allocation3 + $0x30] sm:$0xff]  ;;  %v72_v0 = vld [vmem:[#allocation3 + $0x38] sm:$0xff] }
  0x30   :  { %v101_v38 = vmul.f32 %v776_v25, %v73_v18  ;;  %v112_v42 = vmul.f32 %v778_v26, %v84_v34  ;;  %v103_v43 = vmul.f32 %v776_v25, %v75_v20  ;;  %v111_v48 = vmul.f32 %v776_v25, %v83_v33  ;;  %v628_v5 = vld [vmem:[#allocation6 + $0x38] sm:$0xff]  }
  0x31   :  { %555 = vmatpush3.bf16.msra.mxu0 %v618_v6  ;;  %600 = vmatpush3.bf16.msra.mxu1 %v618_v6  ;;  %v110_v41 = vmul.f32 %v778_v26, %v82_v32  ;;  %v109_v44 = vmul.f32 %v776_v25, %v81_v31  ;;  %v130_v45 = vadd.f32 %v782_v28, %v102_v36  ;;  %v77_v13 = vunpack.c.l.bf16 %v784_v29 }
  0x32   :  { %556 = vmatprep.subr.bf16.mxu0 %v619_v7  ;;  %593 = vmatprep.subr.bf16.mxu1 %v619_v7  ;;  %v132_v46 = vadd.f32 %v782_v28, %v104_v37  ;;  %v129_v47 = vadd.f32 %v780_v27, %v101_v38  ;;  %v140_v51 = vadd.f32 %v782_v28, %v112_v42  ;;  %v79_v16 = vunpack.c.l.bf16 %v68_v39 }
  0x33   :  { %v138_v50 = vadd.f32 %v782_v28, %v110_v41  ;;  %v131_v52 = vadd.f32 %v780_v27, %v103_v43  ;;  %v146_v55 = vmax.f32 %v130_v45, 0.0  ;;  %v137_v58 = vadd.f32 %v780_v27, %v109_v44 }
  0x34   :  { %v148_v56 = vmax.f32 %v132_v46, 0.0  ;;  %v145_v57 = vmax.f32 %v129_v47, 0.0  ;;  %v156_v61 = vmax.f32 %v140_v51, 0.0  ;;  %v139_v63 = vadd.f32 %v780_v27, %v111_v48  ;;  %v509_v46 = vld [vmem:[%s845_s4] ss:$0 sm:$0xff]  ;;  %s707_s4 = smov [#allocation8]  }
  0x35   :  { %557 = vmatpush3.bf16.msra.mxu0 %v620_v9  ;;  %601 = vmatpush3.bf16.msra.mxu1 %v620_v9  ;;  %v154_v60 = vmax.f32 %v138_v50, 0.0  ;;  %v147_v62 = vmax.f32 %v131_v52, 0.0  ;;  %v153_v2 = vmax.f32 %v137_v58, 0.0  ;;  %v106_v3 = vmul.f32 %v778_v26, %v78_v40  ;;  %v510_v51 = vld [vmem:[%s846_s5] ss:$0 sm:$0xff]  ;;  %s480_s5 = sshll.u32 %s707_s4, 4  ;;  %s481_s5 = int_to_ptr.vmem [resolvable:$true] %s480_s5 }
  0x36   :  { %558 = vmatprep.subr.bf16.mxu0 %v621_v10  ;;  %594 = vmatprep.subr.bf16.mxu1 %v621_v10  ;;  %v162_v1 = vpack.c.bf16 %v148_v56, %v146_v55  ;;  %v108_v4 = vmul.f32 %v778_v26, %v80_v53  ;;  %v155_v8 = vmax.f32 %v139_v63, 0.0  ;;  %v86_v9 = vunpack.c.h.bf16 %v71_v59  ;;  %s673_s29 = scalar_lea.vmem %s481_s5, 512  ;;  %p678_p3 = scmp.lt.s32.totalorder %s481_s5, %s481_s5 }
  0x37   :  { %v166_v6 = vpack.c.bf16 %v156_v61, %v154_v60  ;;  %v161_v7 = vpack.c.bf16 %v147_v62, %v145_v57  ;;  %v134_v10 = vadd.f32 %v782_v28, %v106_v3  ;;  %v85_v17 = vunpack.c.l.bf16 %v71_v59  ;;  %p674_p2 = scmp.ne.s32.totalorder %s481_s5, %s673_s29  ;;  %p679_p4 = scmp.lt.s32.totalorder %s673_s29, %s673_s29 }
  0x38   :  { %v136_v11 = vadd.f32 %v782_v28, %v108_v4  ;;  %337 = vmatprep.mubr.bf16.mxu0 %v162_v1  ;;  %v114_v15 = vmul.f32 %v778_v26, %v86_v9  ;;  %v105_v21 = vmul.f32 %v776_v25, %v77_v13  ;;  %v107_v23 = vmul.f32 %v776_v25, %v79_v16 }
  0x39   :  { %559 = vmatpush3.bf16.msra.mxu0 %v622_v12  ;;  %602 = vmatpush3.bf16.msra.mxu1 %v622_v12  ;;  %v88_v12 = vunpack.c.h.bf16 %v72_v0  ;;  %v150_v18 = vmax.f32 %v134_v10, 0.0  ;;  %v87_v24 = vunpack.c.l.bf16 %v72_v0  ;;  %v113_v29 = vmul.f32 %v776_v25, %v85_v17  ;;  %p680_p5 = por %p679_p4, %p678_p3 }
  0x3a   :  { %560 = vmatprep.subr.bf16.mxu0 %v623_v14  ;;  %595 = vmatprep.subr.bf16.mxu1 %v623_v14  ;;  %v165_v14 = vpack.c.bf16 %v155_v8, %v153_v2  ;;  %v152_v19 = vmax.f32 %v136_v11, 0.0  ;;  %v142_v22 = vadd.f32 %v782_v28, %v114_v15  ;;  %v133_v32 = vadd.f32 %v780_v27, %v105_v21 }
  0x3b   :  { %353 = vmatprep.mubr.bf16.mxu1 %v166_v6  ;;  %v116_v20 = vmul.f32 %v778_v26, %v88_v12  ;;  %v135_v34 = vadd.f32 %v780_v27, %v107_v23  ;;  %v115_v26 = vmul.f32 %v776_v25, %v87_v24  ;;  %p681_p6 = pnand %p680_p5, %p674_p2 }
  0x3c   :  { %v158_v33 = vmax.f32 %v142_v22, 0.0  ;;  %v149_v37 = vmax.f32 %v133_v32, 0.0 }
  0x3d   :  { %561 = vmatpush3.bf16.msra.mxu0 %v624_v30  ;;  %603 = vmatpush3.bf16.msra.mxu1 %v624_v30  ;;  %v164_v30 = vpack.c.bf16 %v152_v19, %v150_v18  ;;  %v144_v31 = vadd.f32 %v782_v28, %v116_v20  ;;  %v151_v38 = vmax.f32 %v135_v34, 0.0  ;;  %v143_v39 = vadd.f32 %v780_v27, %v115_v26 }
  0x3e   :  { %562 = vmatprep.subr.bf16.mxu0 %v625_v35  ;;  %596 = vmatprep.subr.bf16.mxu1 %v625_v35  ;;  %v141_v35 = vadd.f32 %v780_v27, %v113_v29 }
  0x3f   :  { %v160_v36 = vmax.f32 %v144_v31, 0.0  ;;  %v159_v28 = vmax.f32 %v143_v39, 0.0  ;;  %v163_v42 = vpack.c.bf16 %v151_v38, %v149_v37 }
  0x40   :  { %v157_v40 = vmax.f32 %v141_v35, 0.0 }
  0x41   :  { %563 = vmatpush3.bf16.msra.mxu0 %v626_v49  ;;  %604 = vmatpush3.bf16.msra.mxu1 %v626_v49  ;;  %v168_v41 = vpack.c.bf16 %v160_v36, %v158_v33 }
  0x42   :  { %564 = vmatprep.subr.bf16.mxu0 %v627_v54  ;;  %597 = vmatprep.subr.bf16.mxu1 %v627_v54  ;;  %v167_v43 = vpack.c.bf16 %v159_v28, %v157_v40 }
  0x45   :  { %565 = vmatpush3.bf16.msra.mxu0 %v628_v5  ;;  %605 = vmatpush3.bf16.msra.mxu1 %v628_v5 }
  0x48   :  { %338 = vmatmul.mubr.bf16.vlgmr.msra.gmra.mrb[0].mxu0 %v161_v7  ;;  %354 = vmatmul.mubr.bf16.vlgmr.msra.gmra.mrb[0].mxu1 %v165_v14 }
  0x49   :  { %345 = vmatprep.mubr.bf16.mxu0 %v164_v30  ;;  %361 = vmatprep.mubr.bf16.mxu1 %v168_v41 }
  0x50   :  { %346 = vmatmul.mubr.bf16.gmra.mrb[4].mxu0 %v163_v42  ;;  %362 = vmatmul.mubr.bf16.gmra.mrb[4].mxu1 %v167_v43 }
 0x11b   :  { %v566_v44 = vpop.f32.mrb[0].mxu0  ;;  %v578_v25 = vpop.f32.mrb[0].mxu1 }
 0x11c   :  { %v567_v45 = vpop.f32.mrb[1].mxu0  ;;  %v579_v47 = vpop.f32.mrb[1].mxu1 }
 0x11d   :  { %v568_v48 = vadd.f32 %v567_v45, %v566_v44  ;;  %v580_v49 = vadd.f32 %v579_v47, %v578_v25  ;;  %v569_v50 = vpop.f32.mrb[2].mxu0  ;;  %v581_v27 = vpop.f32.mrb[2].mxu1 }
 0x11e   :  { %v570_v52 = vpop.f32.mrb[3].mxu0  ;;  %v582_v53 = vpop.f32.mrb[3].mxu1 }
 0x11f   :  { %v404_v54 = vmul.f32 %v568_v48, %v509_v46  ;;  %v408_v55 = vmul.f32 %v580_v49, %v509_v46  ;;  %v571_v56 = vadd.f32 %v570_v52, %v569_v50  ;;  %v583_v57 = vadd.f32 %v582_v53, %v581_v27 }
 0x121   :  { %v419_v58 = vadd.f32 %v510_v51, %v404_v54  ;;  %v423_v59 = vadd.f32 %v510_v51, %v408_v55  ;;  %v405_v60 = vmul.f32 %v571_v56, %v509_v46  ;;  %v409_v61 = vmul.f32 %v583_v57, %v509_v46 }
 0x123   :  { %v420_v62 = vadd.f32 %v510_v51, %v405_v60  ;;  %v424_v63 = vadd.f32 %v510_v51, %v409_v61  ;;  %v572_v0 = vpop.f32.mrb[4].mxu0  ;;  %v584_v1 = vpop.f32.mrb[4].mxu1  ;;  %v427_v2 = vmax.f32 %v419_v58, 0.0  ;;  %v431_v3 = vmax.f32 %v423_v59, 0.0 }
 0x124   :  { %v573_v4 = vpop.f32.mrb[5].mxu0  ;;  %v585_v5 = vpop.f32.mrb[5].mxu1 }
 0x125   :  { %v428_v6 = vmax.f32 %v420_v62, 0.0  ;;  %v432_v7 = vmax.f32 %v424_v63, 0.0  ;;  %v574_v8 = vadd.f32 %v573_v4, %v572_v0  ;;  %v586_v9 = vadd.f32 %v585_v5, %v584_v1  ;;  %v575_v10 = vpop.f32.mrb[6].mxu0  ;;  %v587_v11 = vpop.f32.mrb[6].mxu1 }
 0x126   :  { %v576_v12 = vpop.f32.mrb[7].mxu0  ;;  %v588_v13 = vpop.f32.mrb[7].mxu1 }
 0x127   :  { %v530_v14 = vpack.c.bf16 %v428_v6, %v427_v2  ;;  %v540_v15 = vpack.c.bf16 %v432_v7, %v431_v3  ;;  %v406_v16 = vmul.f32 %v574_v8, %v509_v46  ;;  %v410_v17 = vmul.f32 %v586_v9, %v509_v46 }
 0x128   :  { %v577_v18 = vadd.f32 %v576_v12, %v575_v10  ;;  %v589_v19 = vadd.f32 %v588_v13, %v587_v11 }
 0x129   :  { %531 = vst [vmem:[#allocation8] sm:$0xff] %v530_v14   ;;  %548 = vst [vmem:[#allocation8 + $0x10] sm:$0xff] %v540_v15   ;;  %v421_v20 = vadd.f32 %v510_v51, %v406_v16  ;;  %v425_v21 = vadd.f32 %v510_v51, %v410_v17 }
 0x12a   :  { %v407_v22 = vmul.f32 %v577_v18, %v509_v46  ;;  %v411_v23 = vmul.f32 %v589_v19, %v509_v46 }
 0x12b   :  { %v429_v30 = vmax.f32 %v421_v20, 0.0  ;;  %v433_v31 = vmax.f32 %v425_v21, 0.0 }
 0x12c   :  { %v422_v24 = vadd.f32 %v510_v51, %v407_v22  ;;  %v426_v29 = vadd.f32 %v510_v51, %v411_v23 }
 0x12e   :  { %v430_v32 = vmax.f32 %v422_v24, 0.0  ;;  %v434_v33 = vmax.f32 %v426_v29, 0.0 }
 0x130   :  { %v535_v34 = vpack.c.bf16 %v430_v32, %v429_v30  ;;  %v545_v26 = vpack.c.bf16 %v434_v33, %v433_v31 }
 0x132   :  { %547 = vst [vmem:[#allocation8 + $0x8] sm:$0xff] %v535_v34   ;;  %549 = vst [vmem:[#allocation8 + $0x18] sm:$0xff] %v545_v26  }
 0x133   :  { %684 = shalt.err (!%p681_p6)
}
 0x134   :  { %s685_s8 = scalar_lea.hbm %s847_s6, 512 }
 0x135   :  { %p686_p7 = scmp.ne.s32.totalorder %s847_s6, %s685_s8  ;;  %p689_p8 = scmp.lt.u32.totalorder %s685_s8, %s847_s6 }
 0x137   :  { %p691_p9 = pnand %p689_p8, %p686_p7 }
 0x139   :  { %694 = shalt.err (!%p691_p9)
}
 0x13a   :  { %486 = dma.vmem_to_hbm [thread:$0]  %s481_s5, 512, %s847_s6, [#allocation5], %s705_s0, %s705_s0, %s706_s21  }
 0x13b   :  { %699 = dma.done.wait [#allocation5], 512  }
 0x13c   :  { %700 = vsyncadd [#allocation5], 4294966784 }
 0x13d   :  { %490 = vsyncpa [#allocation4], 1 }
 0x13e   :  { %491 = vsyncpa [#allocation7], 1 }
 0x13f   :  { %492 = vsyncpa [#allocation5], 1 }

</bundles_post_ra>
